<compile_context>
chip_gen: v7x
topology: tpu7x:2x2x1
jax: 0.10.0
libtpu: 0.0.40
codegen_flags: <defaults>
</compile_context>

<pallas_src>
import functools

import jax
import jax.numpy as jnp
from jax.experimental import pallas as pl
from jax.experimental.pallas import tpu as pltpu

BN_EPS = 1e-5
LANE = 128
VMEM_LIMIT = 32 * 1024 * 1024  # safe on v5e/v6e (128 MiB) and v7x (64 MiB)


def autopad(k, p=None):
    if p is None:
        p = k // 2 if isinstance(k, int) else [x // 2 for x in k]
    return p


def _round_up(x, m):
    return (x + m - 1) // m * m


# ---------------------------------------------------------------------------
# Pass 1: conv-as-matmul (bf16 in, f32 acc) + per-channel sum / sumsq
# ---------------------------------------------------------------------------
def _matmul_stats_kernel(p_ref, w_ref, y_ref, sum_ref, sq_ref):
    # p_ref : [TILE_M, K]   bf16 im2col patch tile
    # w_ref : [K, C2p]      bf16 flattened conv weight (grid-resident)
    # y_ref : [TILE_M, C2p] bf16 conv output tile (intermediate)
    # sum_ref, sq_ref : [1, C2p] f32 accumulators (grid-resident)
    y = jnp.dot(p_ref[...], w_ref[...], preferred_element_type=jnp.float32)
    y_ref[...] = y.astype(y_ref.dtype)

    @pl.when(pl.program_id(0) == 0)
    def _init():
        sum_ref[...] = jnp.zeros_like(sum_ref)
        sq_ref[...] = jnp.zeros_like(sq_ref)

    # Cross-sublane reductions go to the XLU; hidden under the MXU matmul.
    sum_ref[...] += jnp.sum(y, axis=0, keepdims=True)
    sq_ref[...] += jnp.sum(y * y, axis=0, keepdims=True)


# ---------------------------------------------------------------------------
# Pass 2: folded BatchNorm affine + Mish
# ---------------------------------------------------------------------------
def _bn_mish_kernel(y_ref, scale_ref, shift_ref, o_ref):
    # z = (y - mean) * rsqrt(var+eps) * gamma + beta, pre-folded to y*scale+shift
    z = y_ref[...].astype(jnp.float32) * scale_ref[...] + shift_ref[...]
    # Mish: z * tanh(softplus(z)) == z * ((1+e^z)^2 - 1) / ((1+e^z)^2 + 1)
    # one EUP exp + one approx reciprocal; clamp so e^z never overflows.
    zc = jnp.minimum(z, 20.0)
    e = jnp.exp(zc)
    t = (1.0 + e) * (1.0 + e)
    tanh_sp = (t - 1.0) * pl.reciprocal(t + 1.0, approx=True)
    o_ref[...] = z * jnp.where(z > 20.0, 1.0, tanh_sp)


# ---------------------------------------------------------------------------
# im2col (NHWC, channel-last -> lane-friendly, no 5-D transpose)
# ---------------------------------------------------------------------------
def _im2col_nhwc(x_nhwc, k, s, p):
    n, h, w, c1 = x_nhwc.shape
    xp = jnp.pad(x_nhwc, ((0, 0), (p, p), (p, p), (0, 0)))
    ho = (h + 2 * p - k) // s + 1
    wo = (w + 2 * p - k) // s + 1
    taps = []
    for kh in range(k):
        for kw in range(k):
            taps.append(xp[:, kh:kh + s * ho:s, kw:kw + s * wo:s, :])  # [N,Ho,Wo,C1]
    pt = jnp.stack(taps, axis=3)                       # [N, Ho, Wo, k*k, C1]
    return pt.reshape(n * ho * wo, k * k * c1), ho, wo


# ---------------------------------------------------------------------------
# Wrapper: Conv(c1, c2, k, s, p, g=1, act=True).forward(x), NCHW in / NCHW out
# ---------------------------------------------------------------------------
@functools.partial(jax.jit, static_argnames=("k", "s", "p", "tile_m"))
def conv_forward(x, weight, gamma, beta, *, k=1, s=1, p=None, tile_m=512):
    assert tile_m % 128 == 0, "tile_m must be a multiple of 128"
    p = autopad(k, p)
    n, c1, h, w = x.shape
    c2 = weight.shape[0]

    # One NCHW -> NHWC conversion; bf16 halves im2col / matmul DMA bytes.
    x_nhwc = x.transpose(0, 2, 3, 1).astype(jnp.bfloat16)
    patches, ho, wo = _im2col_nhwc(x_nhwc, k, s, p)     # [M, K] bf16
    kk = patches.shape[1]
    m = n * ho * wo

    # Pad rows to a multiple of tile_m (zero rows are exact for the BN stats:
    # they contribute 0 to sum/sumsq and we divide by the true m).
    m_pad = _round_up(m, tile_m)
    if m_pad != m:
        patches = jnp.pad(patches, ((0, m_pad - m), (0, 0)))
    mt = m_pad // tile_m

    # Pad channels to a lane-dense multiple of 128 (zero weight/gamma/beta,
    # so padded channels stay exactly 0 and are sliced off below).
    c2p = _round_up(c2, LANE)
    w_mat = weight.transpose(2, 3, 1, 0).reshape(kk, c2)        # (kh,kw,c1)-major
    w_mat = jnp.pad(w_mat, ((0, 0), (0, c2p - c2))).astype(jnp.bfloat16)
    gamma_p = jnp.pad(gamma.astype(jnp.float32), (0, c2p - c2))
    beta_p = jnp.pad(beta.astype(jnp.float32), (0, c2p - c2))

    # ---- pass 1: matmul + batch-stat accumulation (sequential grid axis) ----
    y_flat, ssum, ssq = pl.pallas_call(
        _matmul_stats_kernel,
        out_shape=(
            jax.ShapeDtypeStruct((m_pad, c2p), jnp.bfloat16),
            jax.ShapeDtypeStruct((1, c2p), jnp.float32),
            jax.ShapeDtypeStruct((1, c2p), jnp.float32),
        ),
        grid=(mt,),
        in_specs=[
            pl.BlockSpec((tile_m, kk), lambda i: (i, 0)),
            pl.BlockSpec((kk, c2p), lambda i: (0, 0)),
        ],
        out_specs=(
            pl.BlockSpec((tile_m, c2p), lambda i: (i, 0)),
            pl.BlockSpec((1, c2p), lambda i: (0, 0)),
            pl.BlockSpec((1, c2p), lambda i: (0, 0)),
        ),
        compiler_params=pltpu.CompilerParams(
            dimension_semantics=("arbitrary",),
            vmem_limit_bytes=VMEM_LIMIT,
        ),
    )(patches, w_mat)

    # Fold BN (training-mode batch stats, biased variance) into per-channel
    # scale / shift (tiny (c2p,) vectors -> plain XLA ops).
    mean = ssum[0] / m
    var = jnp.maximum(ssq[0] / m - mean * mean, 0.0)
    scale = gamma_p * jax.lax.rsqrt(var + BN_EPS)
    shift = beta_p - mean * scale

    # ---- pass 2: normalize + Mish (parallel grid axis) ----------------------
    out_flat = pl.pallas_call(
        _bn_mish_kernel,
        out_shape=jax.ShapeDtypeStruct((m_pad, c2p), jnp.float32),
        grid=(mt,),
        in_specs=[
            pl.BlockSpec((tile_m, c2p), lambda i: (i, 0)),
            pl.BlockSpec((1, c2p), lambda i: (0, 0)),
            pl.BlockSpec((1, c2p), lambda i: (0, 0)),
        ],
        out_specs=pl.BlockSpec((tile_m, c2p), lambda i: (i, 0)),
        compiler_params=pltpu.CompilerParams(
            dimension_semantics=("parallel",),
            vmem_limit_bytes=VMEM_LIMIT,
        ),
    )(y_flat, scale.reshape(1, c2p), shift.reshape(1, c2p))

    # Slice off padding, back to NCHW to match the PyTorch module's layout.
    return out_flat[:m, :c2].reshape(n, ho, wo, c2).transpose(0, 3, 1, 2)


# ---------------------------------------------------------------------------
# Pure-JAX f32 reference (sanity check)
# ---------------------------------------------------------------------------
def _reference(x, weight, gamma, beta, k, s, p):
    p = autopad(k, p)
    y = jax.lax.conv_general_dilated(
        x, weight, (s, s), [(p, p), (p, p)],
        dimension_numbers=("NCHW", "OIHW", "NCHW"),
        precision=jax.lax.Precision.HIGHEST,
    )
    mean = jnp.mean(y, axis=(0, 2, 3), keepdims=True)
    var = jnp.mean((y - mean) ** 2, axis=(0, 2, 3), keepdims=True)
    z = (y - mean) * jax.lax.rsqrt(var + BN_EPS)
    z = z * gamma.reshape(1, -1, 1, 1) + beta.reshape(1, -1, 1, 1)
    return z * jnp.tanh(jax.nn.softplus(z))


if __name__ == "__main__":
    # Module config: Conv(c1=4, c2=8, k=3, s=1) -> p = autopad(3) = 1
    N, C1, H, W = 2, 4, 16, 16
    C2, K, S = 8, 3, 1

    key = jax.random.PRNGKey(0)
    kx, kw_, kg, kb = jax.random.split(key, 4)
    x = jax.random.normal(kx, (N, C1, H, W), dtype=jnp.float32)
    weight = 0.1 * jax.random.normal(kw_, (C2, C1, K, K), dtype=jnp.float32)
    gamma = 1.0 + 0.1 * jax.random.normal(kg, (C2,), dtype=jnp.float32)
    beta = 0.05 * jax.random.normal(kb, (C2,), dtype=jnp.float32)

    # tile_m=128 here so the 512-row test problem exercises the multi-tile grid
    # and cross-tile BN accumulation; use the 512-2048 default for real shapes.
    out = conv_forward(x, weight, gamma, beta, k=K, s=S, p=None, tile_m=128)
    out = jax.block_until_ready(out)

    ref = _reference(x, weight, gamma, beta, K, S, None)
    assert out.shape == (N, C2, H, W), out.shape
    max_err = float(jnp.max(jnp.abs(out - ref)))
    # bf16 matmul operands + bf16 intermediate (f32 accumulation / f32 BN stats)
    # -> slightly looser tolerance vs the all-f32 reference.
    assert jnp.allclose(out, ref, atol=3e-2, rtol=3e-2), max_err
    print("KERNEL_OK")
</pallas_src>

<mosaic_0001>
module attributes {stable_mosaic.version = 11 : i64} {
  func.func @_matmul_stats_kernel(%arg0: i32, %arg1: memref<128x36xbf16, #tpu.memory_space<vmem>>, %arg2: memref<36x128xbf16, #tpu.memory_space<vmem>>, %arg3: memref<128x128xbf16, #tpu.memory_space<vmem>>, %arg4: memref<1x128xf32, #tpu.memory_space<vmem>>, %arg5: memref<1x128xf32, #tpu.memory_space<vmem>>) attributes {dimension_semantics = [#tpu.dimension_semantics<arbitrary>], iteration_bounds = array<i64: 4>, scalar_prefetch = 0 : i64, scratch_operands = 0 : i64, tpu.core_type = #tpu.core_type<tc>, window_params = [{transform_indices = @transform_0, window_bounds = array<i64: 128, 36>}, {pipeline_mode = #tpu.pipeline_mode<synchronous>, transform_indices = @transform_1, window_bounds = array<i64: 36, 128>}, {transform_indices = @transform_2, window_bounds = array<i64: 128, 128>}, {pipeline_mode = #tpu.pipeline_mode<synchronous>, transform_indices = @transform_3, window_bounds = array<i64: 1, 128>}, {pipeline_mode = #tpu.pipeline_mode<synchronous>, transform_indices = @transform_4, window_bounds = array<i64: 1, 128>}]} {
    %c0 = arith.constant 0 : index
    %c0_0 = arith.constant 0 : index
    %0 = vector.load %arg1[%c0, %c0_0] : memref<128x36xbf16, #tpu.memory_space<vmem>>, vector<128x36xbf16>
    %c0_1 = arith.constant 0 : index
    %c0_2 = arith.constant 0 : index
    %1 = vector.load %arg2[%c0_1, %c0_2] : memref<36x128xbf16, #tpu.memory_space<vmem>>, vector<36x128xbf16>
    %cst = arith.constant dense<0.000000e+00> : vector<128x128xf32>
    %2 = tpu.matmul %0, %1, %cst {dimension_numbers = #tpu.dot_dimension_numbers<[1], [0], [0], [1], [0, 0, 1, 1], [], []>} : vector<128x36xbf16>, vector<36x128xbf16>, vector<128x128xf32> -> vector<128x128xf32>
    %3 = arith.truncf %2 : vector<128x128xf32> to vector<128x128xbf16>
    %c0_3 = arith.constant 0 : index
    %c0_4 = arith.constant 0 : index
    %4 = vector.load %arg3[%c0_3, %c0_4] : memref<128x128xbf16, #tpu.memory_space<vmem>>, vector<128x128xbf16>
    tpu.vector_store %arg3[%c0_3, %c0_4], %3 {strides = array<i32>} : memref<128x128xbf16, #tpu.memory_space<vmem>>, vector<128x128xbf16>,
    %c0_i32 = arith.constant 0 : i32
    %5 = arith.cmpi eq, %arg0, %c0_i32 : i32
    %6 = arith.extui %5 : i1 to i32
    %c0_i32_5 = arith.constant 0 : i32
    %7 = arith.cmpi ne, %6, %c0_i32_5 : i32
    scf.if %7 {
      %cst_16 = arith.constant 0.000000e+00 : f32
      %19 = vector.broadcast %cst_16 : f32 to vector<1x128xf32>
      %c0_17 = arith.constant 0 : index
      %c0_18 = arith.constant 0 : index
      %20 = vector.load %arg4[%c0_17, %c0_18] : memref<1x128xf32, #tpu.memory_space<vmem>>, vector<1x128xf32>
      tpu.vector_store %arg4[%c0_17, %c0_18], %19 {strides = array<i32>} : memref<1x128xf32, #tpu.memory_space<vmem>>, vector<1x128xf32>,
      %cst_19 = arith.constant 0.000000e+00 : f32
      %21 = vector.broadcast %cst_19 : f32 to vector<1x128xf32>
      %c0_20 = arith.constant 0 : index
      %c0_21 = arith.constant 0 : index
      %22 = vector.load %arg5[%c0_20, %c0_21] : memref<1x128xf32, #tpu.memory_space<vmem>>, vector<1x128xf32>
      tpu.vector_store %arg5[%c0_20, %c0_21], %21 {strides = array<i32>} : memref<1x128xf32, #tpu.memory_space<vmem>>, vector<1x128xf32>,
    } else {
    }
    %c0_6 = arith.constant 0 : index
    %c0_7 = arith.constant 0 : index
    %8 = vector.load %arg4[%c0_6, %c0_7] : memref<1x128xf32, #tpu.memory_space<vmem>>, vector<1x128xf32>
    %cst_8 = arith.constant dense<0.000000e+00> : vector<128xf32>
    %9 = vector.multi_reduction <add>, %2, %cst_8 [0] : vector<128x128xf32> to vector<128xf32>
    %10 = vector.shape_cast %9 : vector<128xf32> to vector<1x128xf32>
    %11 = arith.addf %8, %10 : vector<1x128xf32>
    %c0_9 = arith.constant 0 : index
    %c0_10 = arith.constant 0 : index
    %12 = vector.load %arg4[%c0_9, %c0_10] : memref<1x128xf32, #tpu.memory_space<vmem>>, vector<1x128xf32>
    tpu.vector_store %arg4[%c0_9, %c0_10], %11 {strides = array<i32>} : memref<1x128xf32, #tpu.memory_space<vmem>>, vector<1x128xf32>,
    %c0_11 = arith.constant 0 : index
    %c0_12 = arith.constant 0 : index
    %13 = vector.load %arg5[%c0_11, %c0_12] : memref<1x128xf32, #tpu.memory_space<vmem>>, vector<1x128xf32>
    %14 = arith.mulf %2, %2 : vector<128x128xf32>
    %cst_13 = arith.constant dense<0.000000e+00> : vector<128xf32>
    %15 = vector.multi_reduction <add>, %14, %cst_13 [0] : vector<128x128xf32> to vector<128xf32>
    %16 = vector.shape_cast %15 : vector<128xf32> to vector<1x128xf32>
    %17 = arith.addf %13, %16 : vector<1x128xf32>
    %c0_14 = arith.constant 0 : index
    %c0_15 = arith.constant 0 : index
    %18 = vector.load %arg5[%c0_14, %c0_15] : memref<1x128xf32, #tpu.memory_space<vmem>>, vector<1x128xf32>
    tpu.vector_store %arg5[%c0_14, %c0_15], %17 {strides = array<i32>} : memref<1x128xf32, #tpu.memory_space<vmem>>, vector<1x128xf32>,
    return
  }
  func.func @transform_0(%arg0: i32) -> (i32, i32) {
    %c0_i32 = arith.constant 0 : i32
    %c0_i32_0 = arith.constant 0 : i32
    return %arg0, %c0_i32 : i32, i32
  }
  func.func @transform_1(%arg0: i32) -> (i32, i32) {
    %c0_i32 = arith.constant 0 : i32
    %c0_i32_0 = arith.constant 0 : i32
    %c0_i32_1 = arith.constant 0 : i32
    return %c0_i32, %c0_i32_0 : i32, i32
  }
  func.func @transform_2(%arg0: i32) -> (i32, i32) {
    %c0_i32 = arith.constant 0 : i32
    %c0_i32_0 = arith.constant 0 : i32
    return %arg0, %c0_i32 : i32, i32
  }
  func.func @transform_3(%arg0: i32) -> (i32, i32) {
    %c0_i32 = arith.constant 0 : i32
    %c0_i32_0 = arith.constant 0 : i32
    %c0_i32_1 = arith.constant 0 : i32
    return %c0_i32, %c0_i32_0 : i32, i32
  }
  func.func @transform_4(%arg0: i32) -> (i32, i32) {
    %c0_i32 = arith.constant 0 : i32
    %c0_i32_0 = arith.constant 0 : i32
    %c0_i32_1 = arith.constant 0 : i32
    return %c0_i32, %c0_i32_0 : i32, i32
  }
}

module attributes {stable_mosaic.version = 11 : i64} {
  func.func @_bn_mish_kernel(%arg0: i32, %arg1: memref<128x128xbf16, #tpu.memory_space<vmem>>, %arg2: memref<1x128xf32, #tpu.memory_space<vmem>>, %arg3: memref<1x128xf32, #tpu.memory_space<vmem>>, %arg4: memref<128x128xf32, #tpu.memory_space<vmem>>) attributes {dimension_semantics = [#tpu.dimension_semantics<parallel>], iteration_bounds = array<i64: 4>, scalar_prefetch = 0 : i64, scratch_operands = 0 : i64, tpu.core_type = #tpu.core_type<tc>, window_params = [{transform_indices = @transform_0, window_bounds = array<i64: 128, 128>}, {pipeline_mode = #tpu.pipeline_mode<synchronous>, transform_indices = @transform_1, window_bounds = array<i64: 1, 128>}, {pipeline_mode = #tpu.pipeline_mode<synchronous>, transform_indices = @transform_2, window_bounds = array<i64: 1, 128>}, {transform_indices = @transform_3, window_bounds = array<i64: 128, 128>}]} {
    %c0 = arith.constant 0 : index
    %c0_0 = arith.constant 0 : index
    %0 = vector.load %arg1[%c0, %c0_0] : memref<128x128xbf16, #tpu.memory_space<vmem>>, vector<128x128xbf16>
    %1 = arith.extf %0 : vector<128x128xbf16> to vector<128x128xf32>
    %c0_1 = arith.constant 0 : index
    %c0_2 = arith.constant 0 : index
    %2 = vector.load %arg2[%c0_1, %c0_2] : memref<1x128xf32, #tpu.memory_space<vmem>>, vector<1x128xf32>
    %3 = vector.broadcast %2 : vector<1x128xf32> to vector<128x128xf32>
    %4 = arith.mulf %1, %3 : vector<128x128xf32>
    %c0_3 = arith.constant 0 : index
    %c0_4 = arith.constant 0 : index
    %5 = vector.load %arg3[%c0_3, %c0_4] : memref<1x128xf32, #tpu.memory_space<vmem>>, vector<1x128xf32>
    %6 = vector.broadcast %5 : vector<1x128xf32> to vector<128x128xf32>
    %7 = arith.addf %4, %6 : vector<128x128xf32>
    %cst = arith.constant 2.000000e+01 : f32
    %8 = vector.broadcast %cst : f32 to vector<128x128xf32>
    %9 = arith.minimumf %7, %8 : vector<128x128xf32>
    %10 = math.exp %9 : vector<128x128xf32>
    %cst_5 = arith.constant 1.000000e+00 : f32
    %11 = vector.broadcast %cst_5 : f32 to vector<128x128xf32>
    %12 = arith.addf %11, %10 : vector<128x128xf32>
    %cst_6 = arith.constant 1.000000e+00 : f32
    %13 = vector.broadcast %cst_6 : f32 to vector<128x128xf32>
    %14 = arith.addf %13, %10 : vector<128x128xf32>
    %15 = arith.mulf %12, %14 : vector<128x128xf32>
    %cst_7 = arith.constant 1.000000e+00 : f32
    %16 = vector.broadcast %cst_7 : f32 to vector<128x128xf32>
    %17 = arith.subf %15, %16 : vector<128x128xf32>
    %cst_8 = arith.constant 1.000000e+00 : f32
    %18 = vector.broadcast %cst_8 : f32 to vector<128x128xf32>
    %19 = arith.addf %15, %18 : vector<128x128xf32>
    %20 = tpu.reciprocal %19 {approx = true} : vector<128x128xf32> -> vector<128x128xf32>
    %21 = arith.mulf %17, %20 : vector<128x128xf32>
    %cst_9 = arith.constant 2.000000e+01 : f32
    %22 = vector.broadcast %cst_9 : f32 to vector<128x128xf32>
    %23 = arith.cmpf ogt, %7, %22 : vector<128x128xf32>
    %cst_10 = arith.constant 1.000000e+00 : f32
    %24 = vector.broadcast %cst_10 : f32 to vector<128x128xf32>
    %25 = arith.select %23, %24, %21 : vector<128x128xi1>, vector<128x128xf32>
    %26 = arith.mulf %7, %25 : vector<128x128xf32>
    %c0_11 = arith.constant 0 : index
    %c0_12 = arith.constant 0 : index
    %27 = vector.load %arg4[%c0_11, %c0_12] : memref<128x128xf32, #tpu.memory_space<vmem>>, vector<128x128xf32>
    tpu.vector_store %arg4[%c0_11, %c0_12], %26 {strides = array<i32>} : memref<128x128xf32, #tpu.memory_space<vmem>>, vector<128x128xf32>,
    return
  }
  func.func @transform_0(%arg0: i32) -> (i32, i32) {
    %c0_i32 = arith.constant 0 : i32
    %c0_i32_0 = arith.constant 0 : i32
    return %arg0, %c0_i32 : i32, i32
  }
  func.func @transform_1(%arg0: i32) -> (i32, i32) {
    %c0_i32 = arith.constant 0 : i32
    %c0_i32_0 = arith.constant 0 : i32
    %c0_i32_1 = arith.constant 0 : i32
    return %c0_i32, %c0_i32_0 : i32, i32
  }
  func.func @transform_2(%arg0: i32) -> (i32, i32) {
    %c0_i32 = arith.constant 0 : i32
    %c0_i32_0 = arith.constant 0 : i32
    %c0_i32_1 = arith.constant 0 : i32
    return %c0_i32, %c0_i32_0 : i32, i32
  }
  func.func @transform_3(%arg0: i32) -> (i32, i32) {
    %c0_i32 = arith.constant 0 : i32
    %c0_i32_0 = arith.constant 0 : i32
    return %arg0, %c0_i32 : i32, i32
  }
}

</mosaic_0001>

<bundles_post_ra>
// kernel: conv_forward.3
= control target key start
LH: loop header
LB: loop body
LE: loop exit
PB: predicated region body
PF: predicated region fallthrough
CT: control target
= control target key end

     0   :  { %s684_s12 = smov 0   ;;  %s883_s0 = inlined_call_operand.vmem [shape: bf16[512,128], index: 0, kind: input, shape index: {}]   ;;  %s884_s1 = inlined_call_operand.vmem [shape: f32[1,128], index: 1, kind: input, shape index: {}]   ;;  %s885_s2 = inlined_call_operand.vmem [shape: f32[1,128], index: 2, kind: input, shape index: {}]   ;;  %s886_s3 = inlined_call_operand.vmem [shape: f32[512,128], index: 3, kind: output, shape index: {}]  }
   0x1 LB: > { %s516_s13 = sadd.s32 4294967295, %s662_s12   ;;  %p520_p0 = scmp.ge.s32.totalorder %s662_s12, 1  ;;  %s662_s12 = sphi %s684_s12, %s13_s12  }
   0x2   : > { %p138_p1 = scmp.lt.s32.totalorder %s662_s12, 5 }
   0x4   : > { %p139_p2 = pnand %p520_p0, %p138_p1 }
   0x5   : > { %s521_s14 = sshll.u32 (!%p139_p2), %s516_s13, 4  ;;  %v703_v0 = vld [vmem:[%s884_s1] ss:$0 sm:$0xff] (!%p139_p2) }
   0x6   : > { %142 = sbr.rel (%p139_p2) target bundleno = 104 (0x68), region = 32  ;;  %p163_p3 = scmp.lt.s32.totalorder (!%p139_p2), %s521_s14, 63  ;;  %v712_v9 = vld [vmem:[%s885_s2] ss:$0 sm:$0xff] (!%p139_p2) }
   0xd   : > { %s888_s14 = smov (!%p163_p3, %s521_s14), 63 }
   0xe   : > { %s522_s15 = sshll.u32 %s888_s14, 2  ;;  %s524_s23 = sshll.u32 %s888_s14, 3 }
   0xf   : > { %s698_s18 = scalar_lea.vmem %s883_s0, %s522_s15  ;;  %s813_s26 = scalar_lea.vmem %s886_s3, %s524_s23 }
  0x10   : > { %v546_v1 = vld [vmem:[%s698_s18] sm:$0xff]   ;;  %v577_v2 = vld [vmem:[%s698_s18 + $0x8] sm:$0xff]   ;;  %v578_v3 = vld [vmem:[%s698_s18 + $0x10] sm:$0xff]  }
  0x11   : > { %v547_v4 = vunpack.c.l.bf16 %v546_v1  ;;  %v548_v5 = vunpack.c.h.bf16 %v546_v1  ;;  %v551_v6 = vunpack.c.l.bf16 %v577_v2  ;;  %v552_v7 = vunpack.c.h.bf16 %v577_v2  ;;  %v579_v8 = vld [vmem:[%s698_s18 + $0x18] sm:$0xff]   ;;  %v580_v40 = vld [vmem:[%s698_s18 + $0x20] sm:$0xff]   ;;  %v581_v43 = vld [vmem:[%s698_s18 + $0x28] sm:$0xff]  }
  0x12   : > { %v555_v10 = vunpack.c.l.bf16 %v578_v3  ;;  %v556_v11 = vunpack.c.h.bf16 %v578_v3  ;;  %v559_v12 = vunpack.c.l.bf16 %v579_v8  ;;  %v560_v13 = vunpack.c.h.bf16 %v579_v8  ;;  %v582_v46 = vld [vmem:[%s698_s18 + $0x30] sm:$0xff]  }
  0x13   : > { %v213_v14 = vmul.f32 %v547_v4, %v703_v0  ;;  %v214_v15 = vmul.f32 %v548_v5, %v703_v0  ;;  %v215_v16 = vmul.f32 %v551_v6, %v703_v0  ;;  %v216_v17 = vmul.f32 %v552_v7, %v703_v0 }
  0x14   : > { %v217_v18 = vmul.f32 %v555_v10, %v703_v0  ;;  %v218_v19 = vmul.f32 %v556_v11, %v703_v0  ;;  %v219_v20 = vmul.f32 %v559_v12, %v703_v0  ;;  %v220_v21 = vmul.f32 %v560_v13, %v703_v0 }
  0x15   : > { %v723_v22 = vadd.f32 %v712_v9, %v213_v14  ;;  %v726_v23 = vadd.f32 %v712_v9, %v214_v15  ;;  %v729_v24 = vadd.f32 %v712_v9, %v215_v16  ;;  %v732_v25 = vadd.f32 %v712_v9, %v216_v17 }
  0x16   : > { %v735_v26 = vadd.f32 %v712_v9, %v217_v18  ;;  %v738_v27 = vadd.f32 %v712_v9, %v218_v19  ;;  %v743_v30 = vadd.f32 %v712_v9, %v219_v20  ;;  %v748_v33 = vadd.f32 %v712_v9, %v220_v21 }
  0x17   : > { %v252_v28 = vmin.f32 %v723_v22, 20.0  ;;  %v253_v29 = vmin.f32 %v726_v23, 20.0  ;;  %v254_v31 = vmin.f32 %v729_v24, 20.0  ;;  %v255_v32 = vmin.f32 %v732_v25, 20.0 }
  0x18   : > { %v256_v36 = vmin.f32 %v735_v26, 20.0  ;;  %v257_v39 = vmin.f32 %v738_v27, 20.0  ;;  %v258_v42 = vmin.f32 %v743_v30, 20.0  ;;  %v259_v45 = vmin.f32 %v748_v33, 20.0 }
  0x19   : > { %v268_v34 = vmul.f32 1.442695, %v252_v28  ;;  %v270_v35 = vmul.f32 1.442695, %v253_v29  ;;  %v272_v37 = vmul.f32 1.442695, %v254_v31  ;;  %v563_v48 = vunpack.c.l.bf16 %v580_v40 }
  0x1a   : > { %v274_v38 = vmul.f32 1.442695, %v255_v32  ;;  %v276_v41 = vmul.f32 1.442695, %v256_v36  ;;  %v278_v44 = vmul.f32 1.442695, %v257_v39  ;;  %v564_v49 = vunpack.c.h.bf16 %v580_v40 }
  0x1b   : > { %592 = vpow2.f32 %v268_v34  ;;  %v280_v47 = vmul.f32 1.442695, %v258_v42  ;;  %v282_v50 = vmul.f32 1.442695, %v259_v45  ;;  %v567_v51 = vunpack.c.l.bf16 %v581_v43 }
  0x1c   : > { %594 = vpow2.f32 %v270_v35  ;;  %v568_v52 = vunpack.c.h.bf16 %v581_v43  ;;  %v221_v53 = vmul.f32 %v563_v48, %v703_v0  ;;  %v222_v54 = vmul.f32 %v564_v49, %v703_v0  ;;  %v786_v35 = vld [vmem:[%s698_s18 + $0x38] sm:$0xff]  }
  0x1d   : > { %596 = vpow2.f32 %v272_v37  ;;  %v571_v55 = vunpack.c.l.bf16 %v582_v46  ;;  %v223_v56 = vmul.f32 %v567_v51, %v703_v0  ;;  %v572_v61 = vunpack.c.h.bf16 %v582_v46 }
  0x1e   : > { %598 = vpow2.f32 %v274_v38  ;;  %v224_v57 = vmul.f32 %v568_v52, %v703_v0  ;;  %v762_v58 = vadd.f32 %v712_v9, %v221_v53  ;;  %v765_v59 = vadd.f32 %v712_v9, %v222_v54 }
  0x1f   : > { %600 = vpow2.f32 %v276_v41  ;;  %v768_v60 = vadd.f32 %v712_v9, %v223_v56  ;;  %v225_v1 = vmul.f32 %v571_v55, %v703_v0  ;;  %v226_v11 = vmul.f32 %v572_v61, %v703_v0 }
  0x20   : > { %602 = vpow2.f32 %v278_v44  ;;  %v260_v62 = vmin.f32 %v762_v58, 20.0  ;;  %v261_v63 = vmin.f32 %v765_v59, 20.0  ;;  %v775_v3 = vadd.f32 %v712_v9, %v224_v57 }
  0x21   : > { %604 = vpow2.f32 %v280_v47  ;;  %v262_v2 = vmin.f32 %v768_v60, 20.0  ;;  %v779_v14 = vadd.f32 %v712_v9, %v225_v1  ;;  %v783_v34 = vadd.f32 %v712_v9, %v226_v11 }
  0x22   : > { %606 = vpow2.f32 %v282_v50  ;;  %v284_v5 = vmul.f32 1.442695, %v260_v62  ;;  %v286_v6 = vmul.f32 1.442695, %v261_v63  ;;  %v263_v18 = vmin.f32 %v775_v3, 20.0 }
  0x23   : > { %v288_v10 = vmul.f32 1.442695, %v262_v2  ;;  %v264_v40 = vmin.f32 %v779_v14, 20.0  ;;  %v575_v47 = vunpack.c.l.bf16 %v786_v35  ;;  %vm396_vm0 = vcmp.gt.f32.partialorder %v723_v22, 20.0 }
  0x24   : > { %608 = vpow2.f32 %v284_v5  ;;  %v290_v44 = vmul.f32 1.442695, %v263_v18  ;;  %v265_v50 = vmin.f32 %v783_v34, 20.0  ;;  %vm397_vm1 = vcmp.gt.f32.partialorder %v726_v23, 20.0 }
  0x25   : > { %v593_v4 = vpop.eup %592  ;;  %610 = vpow2.f32 %v286_v6  ;;  %v292_v53 = vmul.f32 1.442695, %v264_v40  ;;  %vm398_vm2 = vcmp.gt.f32.partialorder %v729_v24, 20.0  ;;  %vm399_vm3 = vcmp.gt.f32.partialorder %v732_v25, 20.0 }
  0x26   : > { %v595_v7 = vpop.eup %594  ;;  %v300_v8 = vadd.f32 1.0, %v593_v4  ;;  %612 = vpow2.f32 %v288_v10  ;;  %v227_v63 = vmul.f32 %v575_v47, %v703_v0  ;;  %vm400_vm4 = vcmp.gt.f32.partialorder %v735_v26, 20.0 }
  0x27   : > { %v597_v12 = vpop.eup %596  ;;  %v301_v13 = vadd.f32 1.0, %v595_v7  ;;  %v294_v5 = vmul.f32 1.442695, %v265_v50  ;;  %vm401_vm5 = vcmp.gt.f32.partialorder %v738_v27, 20.0  ;;  %v576_v10 = vunpack.c.h.bf16 %v786_v35 }
  0x28   : > { %v599_v15 = vpop.eup %598  ;;  %v316_v16 = vmul.f32 %v300_v8, %v300_v8  ;;  %v302_v17 = vadd.f32 1.0, %v597_v12  ;;  %vm402_vm6 = vcmp.gt.f32.partialorder %v743_v30, 20.0  ;;  %vm403_vm7 = vcmp.gt.f32.partialorder %v748_v33, 20.0 }
  0x29   : > { %v601_v19 = vpop.eup %600  ;;  %v317_v20 = vmul.f32 %v301_v13, %v301_v13  ;;  %v303_v21 = vadd.f32 1.0, %v599_v15  ;;  %v802_v13 = vadd.f32 %v712_v9, %v227_v63  ;;  %vm404_vm8 = vcmp.gt.f32.partialorder %v762_v58, 20.0 }
  0x2a   : > { %v603_v28 = vpop.eup %602  ;;  %v348_v29 = vadd.f32 1.0, %v316_v16  ;;  %v318_v31 = vmul.f32 %v302_v17, %v302_v17  ;;  %v304_v32 = vadd.f32 1.0, %v601_v19  ;;  %v527_v54 = vadd.f32 -1.0, %v316_v16 }
  0x2b   : > { %v605_v36 = vpop.eup %604  ;;  %v349_v37 = vadd.f32 1.0, %v317_v20  ;;  %v319_v38 = vmul.f32 %v303_v21, %v303_v21  ;;  %v305_v39 = vadd.f32 1.0, %v603_v28  ;;  %v528_v55 = vadd.f32 -1.0, %v317_v20 }
  0x2c   : > { %v607_v41 = vpop.eup %606  ;;  %614 = vrcp.f32 %v348_v29  ;;  %v350_v42 = vadd.f32 1.0, %v318_v31  ;;  %v320_v43 = vmul.f32 %v304_v32, %v304_v32  ;;  %v306_v49 = vadd.f32 1.0, %v605_v36 }
  0x2d   : > { %616 = vrcp.f32 %v349_v37  ;;  %v351_v45 = vadd.f32 1.0, %v319_v38  ;;  %v321_v46 = vmul.f32 %v305_v39, %v305_v39  ;;  %v307_v52 = vadd.f32 1.0, %v607_v41 }
  0x2e   : > { %618 = vrcp.f32 %v350_v42  ;;  %v352_v48 = vadd.f32 1.0, %v320_v43  ;;  %v322_v56 = vmul.f32 %v306_v49, %v306_v49  ;;  %v609_v57 = vpop.eup %608  ;;  %v529_v61 = vadd.f32 -1.0, %v318_v31 }
  0x2f   : > { %620 = vrcp.f32 %v351_v45  ;;  %v353_v51 = vadd.f32 1.0, %v321_v46  ;;  %v323_v62 = vmul.f32 %v307_v52, %v307_v52  ;;  %v611_v1 = vpop.eup %610  ;;  %v308_v4 = vadd.f32 1.0, %v609_v57 }
  0x30   : > { %622 = vrcp.f32 %v352_v48  ;;  %v354_v2 = vadd.f32 1.0, %v322_v56  ;;  %v613_v6 = vpop.eup %612  ;;  %v309_v8 = vadd.f32 1.0, %v611_v1  ;;  %v530_v15 = vadd.f32 -1.0, %v319_v38 }
  0x31   : > { %624 = vrcp.f32 %v353_v51  ;;  %v355_v7 = vadd.f32 1.0, %v323_v62  ;;  %v799_v11 = vmul.f32 %v308_v4, %v308_v4  ;;  %v310_v12 = vadd.f32 1.0, %v613_v6 }
  0x32   : > { %626 = vpow2.f32 %v290_v44  ;;  %v531_v16 = vadd.f32 -1.0, %v320_v43  ;;  %v325_v17 = vmul.f32 %v309_v8, %v309_v8  ;;  %v532_v19 = vadd.f32 -1.0, %v321_v46 }
  0x33   : > { %628 = vpow2.f32 %v292_v53  ;;  %v356_v20 = vadd.f32 1.0, %v799_v11  ;;  %v326_v21 = vmul.f32 %v310_v12, %v310_v12  ;;  %v533_v31 = vadd.f32 -1.0, %v322_v56 }
  0x34   : > { %630 = vrcp.f32 %v354_v2  ;;  %v357_v32 = vadd.f32 1.0, %v325_v17  ;;  %v266_v35 = vmin.f32 %v802_v13, 20.0  ;;  %v228_v39 = vmul.f32 %v576_v10, %v703_v0 }
  0x35   : > { %632 = vrcp.f32 %v355_v7  ;;  %v358_v38 = vadd.f32 1.0, %v326_v21  ;;  %v536_v8 = vadd.f32 -1.0, %v325_v17  ;;  %vm405_vm9 = vcmp.gt.f32.partialorder %v765_v59, 20.0 }
  0x36   : > { %v615_v18 = vpop.eup %614  ;;  %634 = vpow2.f32 %v294_v5  ;;  %v296_v43 = vmul.f32 1.442695, %v266_v35  ;;  %v535_v5 = vadd.f32 -1.0, %v799_v11  ;;  %vm406_vm10 = vcmp.gt.f32.partialorder %v768_v60, 20.0 }
  0x37   : > { %v617_v28 = vpop.eup %616  ;;  %v380_v29 = vmul.f32 %v615_v18, %v527_v54  ;;  %636 = vrcp.f32 %v356_v20  ;;  %v534_v54 = vadd.f32 -1.0, %v323_v62  ;;  %vm407_vm11 = vcmp.gt.f32.partialorder %v775_v3, 20.0 }
  0x38   : > { %v619_v36 = vpop.eup %618  ;;  %v381_v37 = vmul.f32 %v617_v28, %v528_v55  ;;  %638 = vrcp.f32 %v357_v32  ;;  %vm408_vm12 = vcmp.gt.f32.partialorder %v779_v14, 20.0  ;;  %vm409_vm13 = vcmp.gt.f32.partialorder %v783_v34, 20.0 }
  0x39   : > { %v621_v40 = vpop.eup %620  ;;  %v412_v41 = vsel %vm396_vm0, 1.0, %v380_v29  ;;  %v382_v42 = vmul.f32 %v619_v36, %v529_v61  ;;  %640 = vrcp.f32 %v358_v38  ;;  %v832_v61 = vadd.f32 %v712_v9, %v228_v39 }
  0x3a   : > { %v623_v44 = vpop.eup %622  ;;  %v428_v45 = vmul.f32 %v412_v41, %v723_v22  ;;  %v413_v0 = vsel %vm397_vm1, 1.0, %v381_v37  ;;  %v383_v46 = vmul.f32 %v621_v40, %v530_v15  ;;  %642 = vpow2.f32 %v296_v43 }
  0x3b   : > { %v625_v47 = vpop.eup %624  ;;  %v429_v48 = vmul.f32 %v413_v0, %v726_v23  ;;  %v414_v49 = vsel %vm398_vm2, 1.0, %v382_v42  ;;  %v384_v50 = vmul.f32 %v623_v44, %v531_v16  ;;  %v267_v10 = vmin.f32 %v832_v61, 20.0 }
  0x3c   : > { %v627_v51 = vpop.eup %626  ;;  %444 = vst [vmem:[%s813_s26] sm:$0xff] %v428_v45  ;;  %v430_v52 = vmul.f32 %v414_v49, %v729_v24  ;;  %v415_v22 = vsel %vm399_vm3, 1.0, %v383_v46  ;;  %v385_v53 = vmul.f32 %v625_v47, %v532_v19  ;;  %v537_v15 = vadd.f32 -1.0, %v326_v21 }
  0x3d   : > { %v629_v55 = vpop.eup %628  ;;  %445 = vst [vmem:[%s813_s26 + $0x8] sm:$0xff] %v429_v48  ;;  %v431_v23 = vmul.f32 %v415_v22, %v732_v25  ;;  %v416_v56 = vsel %vm400_vm4, 1.0, %v384_v50  ;;  %v311_v57 = vadd.f32 1.0, %v627_v51  ;;  %vm410_vm14 = vcmp.gt.f32.partialorder %v802_v13, 20.0 }
  0x3e   : > { %v631_v63 = vpop.eup %630  ;;  %446 = vst [vmem:[%s813_s26 + $0x10] sm:$0xff] %v430_v52  ;;  %v432_v24 = vmul.f32 %v416_v56, %v735_v26  ;;  %v417_v62 = vsel %vm401_vm5, 1.0, %v385_v53  ;;  %v312_v1 = vadd.f32 1.0, %v629_v55  ;;  %vm411_vm15 = vcmp.gt.f32.partialorder %v832_v61, 20.0 }
  0x3f   : > { %v633_v25 = vpop.eup %632  ;;  %447 = vst [vmem:[%s813_s26 + $0x18] sm:$0xff] %v431_v23  ;;  %v433_v2 = vmul.f32 %v417_v62, %v738_v27  ;;  %v386_v4 = vmul.f32 %v631_v63, %v533_v31  ;;  %v327_v9 = vmul.f32 %v311_v57, %v311_v57 }
  0x40   : > { %v635_v6 = vpop.eup %634  ;;  %448 = vst [vmem:[%s813_s26 + $0x20] sm:$0xff] %v432_v24  ;;  %v387_v7 = vmul.f32 %v633_v25, %v534_v54  ;;  %v328_v26 = vmul.f32 %v312_v1, %v312_v1 }
  0x41   : > { %449 = vst [vmem:[%s813_s26 + $0x28] sm:$0xff] %v433_v2  ;;  %v418_v12 = vsel %vm402_vm6, 1.0, %v386_v4  ;;  %v359_v16 = vadd.f32 1.0, %v327_v9  ;;  %v313_v18 = vadd.f32 1.0, %v635_v6  ;;  %v637_v27 = vpop.eup %636  ;;  %v538_v45 = vadd.f32 -1.0, %v327_v9 }
  0x42   : > { %v434_v19 = vmul.f32 %v418_v12, %v743_v30  ;;  %v419_v11 = vsel %vm403_vm7, 1.0, %v387_v7  ;;  %v360_v17 = vadd.f32 1.0, %v328_v26  ;;  %v639_v20 = vpop.eup %638  ;;  %v388_v29 = vmul.f32 %v637_v27, %v535_v5 }
  0x43   : > { %v435_v28 = vmul.f32 %v419_v11, %v748_v33  ;;  %644 = vrcp.f32 %v359_v16  ;;  %v329_v31 = vmul.f32 %v313_v18, %v313_v18  ;;  %v641_v32 = vpop.eup %640  ;;  %v389_v21 = vmul.f32 %v639_v20, %v536_v8 }
  0x44   : > { %450 = vst [vmem:[%s813_s26 + $0x30] sm:$0xff] %v434_v19  ;;  %646 = vrcp.f32 %v360_v17  ;;  %v298_v30 = vmul.f32 1.442695, %v267_v10  ;;  %v643_v35 = vpop.eup %642  ;;  %v420_v36 = vsel %vm404_vm8, 1.0, %v388_v29  ;;  %v390_v37 = vmul.f32 %v641_v32, %v537_v15 }
  0x45   : > { %451 = vst [vmem:[%s813_s26 + $0x38] sm:$0xff] %v435_v28  ;;  %v361_v33 = vadd.f32 1.0, %v329_v31  ;;  %v436_v38 = vmul.f32 %v420_v36, %v762_v58  ;;  %v421_v39 = vsel %vm405_vm9, 1.0, %v389_v21  ;;  %v314_v40 = vadd.f32 1.0, %v643_v35 }
  0x46   : > { %648 = vpow2.f32 %v298_v30  ;;  %v437_v41 = vmul.f32 %v421_v39, %v765_v59  ;;  %v422_v42 = vsel %vm406_vm10, 1.0, %v390_v37  ;;  %v539_v46 = vadd.f32 -1.0, %v328_v26 }
  0x47   : > { %650 = vrcp.f32 %v361_v33  ;;  %452 = vst [vmem:[%s813_s26 + $0x40] sm:$0xff] %v436_v38  ;;  %v438_v43 = vmul.f32 %v422_v42, %v768_v60  ;;  %v330_v44 = vmul.f32 %v314_v40, %v314_v40  ;;  %v540_v59 = vadd.f32 -1.0, %v329_v31 }
  0x48   : > { %453 = vst [vmem:[%s813_s26 + $0x48] sm:$0xff] %v437_v41 }
  0x49   : > { %454 = vst [vmem:[%s813_s26 + $0x50] sm:$0xff] %v438_v43  ;;  %v362_v0 = vadd.f32 1.0, %v330_v44  ;;  %v541_v23 = vadd.f32 -1.0, %v330_v44 }
  0x4b   : > { %652 = vrcp.f32 %v362_v0 }
  0x4d   : > { %v645_v58 = vpop.eup %644 }
  0x4e   : > { %v647_v47 = vpop.eup %646  ;;  %v391_v48 = vmul.f32 %v645_v58, %v538_v45 }
  0x4f   : > { %v392_v49 = vmul.f32 %v647_v47, %v539_v46 }
  0x50   : > { %v649_v50 = vpop.eup %648  ;;  %v423_v60 = vsel %vm407_vm11, 1.0, %v391_v48 }
  0x51   : > { %v651_v51 = vpop.eup %650  ;;  %v439_v52 = vmul.f32 %v423_v60, %v775_v3  ;;  %v424_v22 = vsel %vm408_vm12, 1.0, %v392_v49  ;;  %v315_v53 = vadd.f32 1.0, %v649_v50 }
  0x52   : > { %v440_v54 = vmul.f32 %v424_v22, %v779_v14  ;;  %v393_v55 = vmul.f32 %v651_v51, %v540_v59 }
  0x53   : > { %455 = vst [vmem:[%s813_s26 + $0x58] sm:$0xff] %v439_v52  ;;  %v331_v56 = vmul.f32 %v315_v53, %v315_v53 }
  0x54   : > { %456 = vst [vmem:[%s813_s26 + $0x60] sm:$0xff] %v440_v54  ;;  %v425_v57 = vsel %vm409_vm13, 1.0, %v393_v55 }
  0x55   : > { %v441_v63 = vmul.f32 %v425_v57, %v783_v34  ;;  %v363_v24 = vadd.f32 1.0, %v331_v56  ;;  %v653_v62 = vpop.eup %652  ;;  %v542_v25 = vadd.f32 -1.0, %v331_v56 }
  0x56   : > { %v394_v3 = vmul.f32 %v653_v62, %v541_v23 }
  0x57   : > { %457 = vst [vmem:[%s813_s26 + $0x68] sm:$0xff] %v441_v63  ;;  %654 = vrcp.f32 %v363_v24 }
  0x58   : > { %v426_v1 = vsel %vm410_vm14, 1.0, %v394_v3 }
  0x59   : > { %v442_v14 = vmul.f32 %v426_v1, %v802_v13 }
  0x5b   : > { %458 = vst [vmem:[%s813_s26 + $0x70] sm:$0xff] %v442_v14 }
  0x61   : > { %v655_v2 = vpop.eup %654 }
  0x62   : > { %v395_v4 = vmul.f32 %v655_v2, %v542_v25 }
  0x64   : > { %v427_v5 = vsel %vm411_vm15, 1.0, %v395_v4 }
  0x65   : > { %v443_v34 = vmul.f32 %v427_v5, %v832_v61 }
  0x67   : > { %459 = vst [vmem:[%s813_s26 + $0x78] sm:$0xff] %v443_v34 }
  0x68 PF: > { %s13_s12 = sadd.s32 1, %s662_s12  }
  0x69   : > { %p10_p4 = scmp.ge.s32.totalorder %s13_s12, 6  }
  0x6b   :  { %12 = sbr.rel (!%p10_p4) target bundleno = 1 (0x1), region = 62 }

// kernel: conv_forward.2
= control target key start
LH: loop header
LB: loop body
LE: loop exit
PB: predicated region body
PF: predicated region fallthrough
CT: control target
= control target key end

     0   :  { %s822_s15 = smov 0   ;;  %s891_s0 = inlined_call_operand.vmem [shape: bf16[512,36], index: 0, kind: input, shape index: {}]   ;;  %s892_s1 = inlined_call_operand.vmem [shape: bf16[36,128], index: 1, kind: input, shape index: {}]   ;;  %s893_s2 = inlined_call_operand.vmem [shape: bf16[512,128], index: 2, kind: output, shape index: {0}]   ;;  %s894_s3 = inlined_call_operand.vmem [shape: f32[1,128], index: 3, kind: output, shape index: {1}]   ;;  %s895_s4 = inlined_call_operand.vmem [shape: f32[1,128], index: 4, kind: output, shape index: {2}]  }
   0x1 LB: > { %s617_s16 = sadd.s32 4294967295, %s794_s15   ;;  %p621_p0 = scmp.ge.s32.totalorder %s794_s15, 1  ;;  %s794_s15 = sphi %s822_s15, %s15_s15  }
   0x2   : > { %p158_p1 = scmp.lt.s32.totalorder %s794_s15, 5 }
   0x4   : > { %p159_p2 = pnand %p621_p0, %p158_p1 }
   0x5   : > { %v777_v0 = vld [vmem:[%s892_s1] sm:$0xff] (!%p159_p2)   ;;  %v778_v1 = vld [vmem:[%s892_s1 + $0x8] sm:$0xff] (!%p159_p2)   ;;  %s622_s21 = sshll.u32 (!%p159_p2), %s617_s16, 4  ;;  %v779_v2 = vld [vmem:[%s892_s1 + $0x10] ss:$0 sps:$4 sm:$0x33] (!%p159_p2)  }
   0x6   : > { %162 = sbr.rel (%p159_p2) target bundleno = 292 (0x124), region = 28  ;;  %738 = vmatprep.subr.bf16.mxu0 (!%p159_p2), %v777_v0  ;;  %760 = vmatprep.subr.bf16.mxu1 (!%p159_p2), %v777_v0  ;;  %p185_p3 = scmp.lt.s32.totalorder (!%p159_p2), %s622_s21, 63  ;;  %vm298_vm0 = vcmask (!%p159_p2), 1041408   ;;  %vm273_vm1 = vcmask (!%p159_p2), 293888  }
   0x7   : > { %739 = vmatpush3.bf16.msra.mxu0 (!%p159_p2), %v777_v0  ;;  %763 = vmatpush3.bf16.msra.mxu1 (!%p159_p2), %v777_v0  ;;  %v300_v3 = vsel (!%p159_p2), %vm298_vm0, %v779_v2, 0  ;;  %p661_p4 = scmp.ne.s32.totalorder (!%p159_p2), %s617_s16, 0 }
   0x8   : > { %740 = vmatprep.subr.bf16.mxu0 (!%p159_p2), %v778_v1  ;;  %761 = vmatprep.subr.bf16.mxu1 (!%p159_p2), %v778_v1 }
   0xb   : > { %741 = vmatpush3.bf16.msra.mxu0 (!%p159_p2), %v778_v1  ;;  %764 = vmatpush3.bf16.msra.mxu1 (!%p159_p2), %v778_v1 }
   0xc   : > { %766 = vmatprep.subr.msk.bf16.mxu0 (!%p159_p2), %vm298_vm0, %v779_v2  ;;  %767 = vmatprep.subr.msk.bf16.mxu1 (!%p159_p2), %vm298_vm0, %v779_v2 }
   0xd   : > { %s897_s21 = smov (!%p185_p3, %s622_s21), 63  ;;  %v796_v36 = vmov (!%p661_p4), 0.0  }
   0xe   : > { %s623_s24 = sshll.u32 %s897_s21, 2  ;;  %483 = vst [vmem:[%s894_s3] sm:$0x1] (!%p661_p4), %v796_v36  ;;  %484 = vst [vmem:[%s895_s4] sm:$0x1] (!%p661_p4), %v796_v36 }
   0xf   : > { %s188_s27 = scalar_lea.vmem %s891_s0, %s623_s24  ;;  %743 = vmatpush3.bf16.msra.mxu0 %v300_v3  ;;  %765 = vmatpush3.bf16.msra.mxu1 %v300_v3  ;;  %s194_s30 = scalar_lea.vmem %s893_s2, %s623_s24 }
  0x10   : > { %v780_v4 = vld [vmem:[%s188_s27] sm:$0xff]   ;;  %v782_v6 = vld [vmem:[%s188_s27 + $0x8] sm:$0xff]   ;;  %v784_v8 = vld [vmem:[%s188_s27 + $0x10] sm:$0xff]  }
  0x11   : > { %v781_v5 = vld [vmem:[%s188_s27 + $0x20] sm:$0xff]   ;;  %744 = vmatprep.mubr.msk.bf16.mxu0 %vm273_vm1, %v780_v4  ;;  %v783_v7 = vld [vmem:[%s188_s27 + $0x28] sm:$0xff]   ;;  %v785_v9 = vld [vmem:[%s188_s27 + $0x30] sm:$0xff]  }
  0x12   : > { %752 = vmatprep.mubr.msk.bf16.mxu1 %vm273_vm1, %v781_v5  ;;  %745 = vmatmul.mubr.msk.bf16.vlgmr.msra.gmra.mrb[0].mxu0 %vm273_vm1, %v782_v6  ;;  %v786_v10 = vld [vmem:[%s188_s27 + $0x18] sm:$0xff]  }
  0x13   : > { %753 = vmatmul.mubr.msk.bf16.vlgmr.msra.gmra.mrb[0].mxu1 %vm273_vm1, %v783_v7  ;;  %748 = vmatprep.mubr.msk.bf16.mxu0 %vm273_vm1, %v784_v8  ;;  %v787_v11 = vld [vmem:[%s188_s27 + $0x38] sm:$0xff]  }
  0x14   : > { %756 = vmatprep.mubr.msk.bf16.mxu1 %vm273_vm1, %v785_v9 }
  0x1a   : > { %749 = vmatmul.mubr.msk.bf16.gmra.mrb[4].mxu0 %vm273_vm1, %v786_v10 }
  0x1b   : > { %757 = vmatmul.mubr.msk.bf16.gmra.mrb[4].mxu1 %vm273_vm1, %v787_v11 }
  0xe5   : > { %v746_v12 = vpop.f32.mrb[0].mxu0 }
  0xe6   : > { %v857_v13 = vpop.f32.mrb[0].mxu1  ;;  %v336_v14 = vpop.f32.mrb[1].mxu0 }
  0xe7   : > { %v368_v15 = vpop.f32.mrb[1].mxu1  ;;  %v747_v16 = vpop.f32.mrb[2].mxu0 }
  0xe8   : > { %v755_v17 = vpop.f32.mrb[2].mxu1  ;;  %v688_v18 = vpack.c.bf16 %v747_v16, %v746_v12  ;;  %v339_v20 = vpop.f32.mrb[3].mxu0 }
  0xe9   : > { %v708_v19 = vpack.c.bf16 %v755_v17, %v857_v13  ;;  %v371_v21 = vpop.f32.mrb[3].mxu1  ;;  %v683_v22 = vpack.c.bf16 %v339_v20, %v336_v14 }
  0xea   : > { %v703_v23 = vpack.c.bf16 %v371_v21, %v368_v15  ;;  %720 = vst [vmem:[%s194_s30 + $0x8] sm:$0xff] %v688_v18  }
  0xeb   : > { %724 = vst [vmem:[%s194_s30 + $0x28] sm:$0xff] %v708_v19   ;;  %684 = vst [vmem:[%s194_s30] sm:$0xff] %v683_v22  }
  0xec   : > { %723 = vst [vmem:[%s194_s30 + $0x20] sm:$0xff] %v703_v23  }
  0xed   : > { %v750_v24 = vpop.f32.mrb[4].mxu0 }
  0xee   : > { %v758_v25 = vpop.f32.mrb[4].mxu1  ;;  %v352_v26 = vpop.f32.mrb[5].mxu0  ;;  %482 = sbr.rel (%p661_p4) target bundleno = 245 (0xf5), region = 32 }
  0xef   : > { %v384_v27 = vpop.f32.mrb[5].mxu1  ;;  %v751_v28 = vpop.f32.mrb[6].mxu0 }
  0xf0   : > { %v759_v29 = vpop.f32.mrb[6].mxu1  ;;  %v698_v30 = vpack.c.bf16 %v751_v28, %v750_v24  ;;  %v355_v32 = vpop.f32.mrb[7].mxu0 }
  0xf1   : > { %v718_v31 = vpack.c.bf16 %v759_v29, %v758_v25  ;;  %v387_v33 = vpop.f32.mrb[7].mxu1  ;;  %v693_v34 = vpack.c.bf16 %v355_v32, %v352_v26 }
  0xf2   : > { %v713_v35 = vpack.c.bf16 %v387_v33, %v384_v27  ;;  %722 = vst [vmem:[%s194_s30 + $0x18] sm:$0xff] %v698_v30  }
  0xf3   : > { %726 = vst [vmem:[%s194_s30 + $0x38] sm:$0xff] %v718_v31   ;;  %721 = vst [vmem:[%s194_s30 + $0x10] sm:$0xff] %v693_v34  }
  0xf4   : > { %725 = vst [vmem:[%s194_s30 + $0x30] sm:$0xff] %v713_v35  }
  0xf5 PF: > { %v486_v37 = vadd.f32 %v339_v20, %v336_v14  ;;  %v510_v38 = vmul.f32 %v336_v14, %v336_v14  ;;  %v511_v39 = vmul.f32 %v339_v20, %v339_v20  ;;  %v512_v41 = vmul.f32 %v746_v12, %v746_v12 }
  0xf6   : > { %v513_v43 = vmul.f32 %v747_v16, %v747_v16  ;;  %v514_v46 = vmul.f32 %v352_v26, %v352_v26  ;;  %v515_v49 = vmul.f32 %v355_v32, %v355_v32  ;;  %v516_v52 = vmul.f32 %v750_v24, %v750_v24 }
  0xf7   : > { %v487_v40 = vadd.f32 %v746_v12, %v486_v37  ;;  %v526_v44 = vadd.f32 %v511_v39, %v510_v38  ;;  %v517_v55 = vmul.f32 %v751_v28, %v751_v28  ;;  %v518_v58 = vmul.f32 %v368_v15, %v368_v15 }
  0xf8   : > { %v519_v61 = vmul.f32 %v371_v21, %v371_v21  ;;  %v520_v0 = vmul.f32 %v857_v13, %v857_v13  ;;  %v521_v3 = vmul.f32 %v755_v17, %v755_v17  ;;  %v522_v6 = vmul.f32 %v384_v27, %v384_v27 }
  0xf9   : > { %v488_v42 = vadd.f32 %v747_v16, %v487_v40  ;;  %v527_v47 = vadd.f32 %v526_v44, %v512_v41  ;;  %v523_v9 = vmul.f32 %v387_v33, %v387_v33  ;;  %v524_v12 = vmul.f32 %v758_v25, %v758_v25 }
  0xfa   : > { %v525_v16 = vmul.f32 %v759_v29, %v759_v29 }
  0xfb   : > { %v489_v45 = vadd.f32 %v488_v42, %v352_v26  ;;  %v528_v50 = vadd.f32 %v527_v47, %v513_v43 }
  0xfd   : > { %v490_v48 = vadd.f32 %v489_v45, %v355_v32  ;;  %v529_v53 = vadd.f32 %v528_v50, %v514_v46 }
  0xff   : > { %v491_v51 = vadd.f32 %v750_v24, %v490_v48  ;;  %v530_v56 = vadd.f32 %v529_v53, %v515_v49 }
 0x101   : > { %v492_v54 = vadd.f32 %v751_v28, %v491_v51  ;;  %v531_v59 = vadd.f32 %v530_v56, %v516_v52  ;;  %v485_v28 = vld [vmem:[%s894_s3] sm:$0x1] }
 0x103   : > { %v493_v57 = vadd.f32 %v492_v54, %v368_v15  ;;  %v532_v62 = vadd.f32 %v531_v59, %v517_v55 }
 0x105   : > { %v494_v60 = vadd.f32 %v493_v57, %v371_v21  ;;  %v533_v1 = vadd.f32 %v532_v62, %v518_v58 }
 0x107   : > { %v495_v63 = vadd.f32 %v857_v13, %v494_v60  ;;  %v534_v4 = vadd.f32 %v533_v1, %v519_v61 }
 0x109   : > { %v496_v2 = vadd.f32 %v755_v17, %v495_v63  ;;  %v535_v7 = vadd.f32 %v534_v4, %v520_v0 }
 0x10b   : > { %v497_v5 = vadd.f32 %v496_v2, %v384_v27  ;;  %v536_v10 = vadd.f32 %v535_v7, %v521_v3 }
 0x10d   : > { %v498_v8 = vadd.f32 %v497_v5, %v387_v33  ;;  %v537_v14 = vadd.f32 %v536_v10, %v522_v6 }
 0x10f   : > { %v499_v11 = vadd.f32 %v758_v25, %v498_v8  ;;  %v538_v18 = vadd.f32 %v537_v14, %v523_v9 }
 0x111   : > { %v500_v15 = vadd.f32 %v759_v29, %v499_v11  ;;  %v539_v20 = vadd.f32 %v538_v18, %v524_v12  ;;  %v509_v29 = vld [vmem:[%s895_s4] sm:$0x1] }
 0x113   : > { %v501_v19 = vrot.slane %v500_v15, 4  ;;  %v540_v13 = vadd.f32 %v539_v20, %v525_v16 }
 0x115   : > { %v502_v21 = vadd.f32 %v501_v19, %v500_v15  ;;  %v541_v23 = vrot.slane %v540_v13, 4 }
 0x117   : > { %v503_v22 = vrot.slane %v502_v21, 2  ;;  %v542_v24 = vadd.f32 %v541_v23, %v540_v13 }
 0x119   : > { %v504_v17 = vadd.f32 %v503_v22, %v502_v21  ;;  %v543_v27 = vrot.slane %v542_v24, 2 }
 0x11b   : > { %v505_v26 = vrot.slane %v504_v17, 1  ;;  %v544_v25 = vadd.f32 %v543_v27, %v542_v24 }
 0x11d   : > { %v506_v30 = vadd.f32 %v505_v26, %v504_v17  ;;  %v545_v32 = vrot.slane %v544_v25, 1 }
 0x11f   : > { %v507_v31 = vadd.f32 %v506_v30, %v485_v28  ;;  %v546_v33 = vadd.f32 %v545_v32, %v544_v25 }
 0x121   : > { %508 = vst [vmem:[%s894_s3] sm:$0x1] %v507_v31  ;;  %v547_v34 = vadd.f32 %v546_v33, %v509_v29 }
 0x123   : > { %548 = vst [vmem:[%s895_s4] sm:$0x1] %v547_v34 }
 0x124 PF: > { %s15_s15 = sadd.s32 1, %s794_s15  }
 0x125   : > { %p12_p5 = scmp.ge.s32.totalorder %s15_s15, 6  }
 0x127   :  { %14 = sbr.rel (!%p12_p5) target bundleno = 1 (0x1), region = 78 }

</bundles_post_ra>
